<compile_context>
chip_gen: v5e
topology: v5e:2x2
jax: 0.10.0
libtpu: 0.0.40
codegen_flags: <defaults>
</compile_context>

<pallas_src>
import jax
import jax.numpy as jnp
from jax.experimental import pallas as pl
from jax.experimental.pallas import tpu as pltpu


def _round_up(x: int, m: int) -> int:
    return ((x + m - 1) // m) * m


def _spoc_kernel(bidx_ref, feat_ref, out_ref, cnt_ref):
    # bidx_ref: (1, tile_n)      int32, batch id per point (-1 for padding)
    # feat_ref: (tile_n, tile_c) f32/bf16, point features for this C-tile
    # out_ref : (B_pad, tile_c)  f32, resident accumulator -> pooled output
    # cnt_ref : (B_pad, 1)       f32, per-batch point counts (scratch)
    ni = pl.program_id(1)

    @pl.when(ni == 0)
    def _init():
        out_ref[...] = jnp.zeros_like(out_ref)
        cnt_ref[...] = jnp.zeros_like(cnt_ref)

    tile_n = bidx_ref.shape[1]
    b_pad = out_ref.shape[0]

    # One-hot membership matrix, already in "transposed" (B_pad, tile_n)
    # orientation so the MXU matmul below needs no operand transpose.
    b_ids = jax.lax.broadcasted_iota(jnp.int32, (b_pad, tile_n), 0)
    onehot_f32 = (bidx_ref[...] == b_ids).astype(jnp.float32)     # (B_pad, tile_n)

    # MXU: per-batch feature sums for this (N-tile, C-tile). Operands in the
    # feature dtype (exact for 0/1), accumulation in f32.
    out_ref[...] += jax.lax.dot_general(
        onehot_f32.astype(feat_ref.dtype), feat_ref[...],
        dimension_numbers=(((1,), (0,)), ((), ())),
        preferred_element_type=jnp.float32)

    # Per-batch point counts (re-derived per C-tile; cheap, keeps "parallel"
    # C-tiles fully independent).
    cnt_ref[...] += jnp.sum(onehot_f32, axis=1, keepdims=True)    # (B_pad, 1)

    @pl.when(ni == pl.num_programs(1) - 1)
    def _finalize():
        inv = pl.reciprocal(jnp.maximum(cnt_ref[...], 1.0), approx=True)
        out_ref[...] = out_ref[...] * inv                         # broadcast over C


def spoc_forward(features: jax.Array, batch_idx: jax.Array, num_batches: int) -> jax.Array:
    """Global average pooling over points grouped by batch index.

    features:   (N, C) float (f32 or bf16)
    batch_idx:  (N,)   int
    returns:    (num_batches, C) float32
    """
    n, c = features.shape
    feat_dtype = jnp.bfloat16 if features.dtype == jnp.bfloat16 else jnp.float32
    features = features.astype(feat_dtype)
    batch_idx = batch_idx.astype(jnp.int32)

    # Padded sizes: B -> multiple of 8 (sublane), C -> multiple of 128 (lane).
    b_pad = _round_up(max(num_batches, 1), 8)
    c_pad = _round_up(c, 128)
    tile_c = next(t for t in (512, 256, 128) if c_pad % t == 0)

    # N tiling: single lane-dense tile for small inputs, 1024-row tiles
    # otherwise (double-buffered feature blocks stay well under VMEM on
    # v5e/v6e/v7x; tile_n is a multiple of 128 so bf16/f32 layouts stay dense).
    tile_n_max = 1024
    tile_n = _round_up(n, 128) if n <= tile_n_max else tile_n_max
    n_pad = _round_up(n, tile_n)

    # Pad: extra feature rows/cols are zero, extra batch ids are -1 so padded
    # points never match any real batch element.
    feat_p = jnp.zeros((n_pad, c_pad), feat_dtype).at[:n, :c].set(features)
    bidx_p = jnp.full((1, n_pad), -1, dtype=jnp.int32).at[0, :n].set(batch_idx)

    grid = (c_pad // tile_c, n_pad // tile_n)

    out = pl.pallas_call(
        _spoc_kernel,
        out_shape=jax.ShapeDtypeStruct((b_pad, c_pad), jnp.float32),
        grid_spec=pltpu.PrefetchScalarGridSpec(
            num_scalar_prefetch=0,
            grid=grid,
            in_specs=[
                pl.BlockSpec((1, tile_n), lambda ci, ni: (0, ni)),        # batch ids
                pl.BlockSpec((tile_n, tile_c), lambda ci, ni: (ni, ci)),  # features
            ],
            out_specs=pl.BlockSpec((b_pad, tile_c), lambda ci, ni: (0, ci)),
            scratch_shapes=[pltpu.VMEM((b_pad, 1), jnp.float32)],
        ),
        compiler_params=pltpu.CompilerParams(
            dimension_semantics=("parallel", "arbitrary"),
            vmem_limit_bytes=32 * 1024 * 1024,
        ),
    )(bidx_p, feat_p)

    return out[:num_batches, :c]


if __name__ == "__main__":
    key = jax.random.PRNGKey(0)
    k_feat, k_idx = jax.random.split(key)

    # Small synthetic "sparse tensor": N points, C channels, B batches.
    B, N, C = 2, 64, 32
    features = jax.random.normal(k_feat, (N, C), dtype=jnp.float32)
    batch_idx = jnp.sort(jax.random.randint(k_idx, (N,), 0, B)).astype(jnp.int32)

    out = spoc_forward(features, batch_idx, B)
    out = jax.block_until_ready(out)

    # Reference check (plain JAX segment mean).
    onehot = (batch_idx[:, None] == jnp.arange(B)[None, :]).astype(jnp.float32)  # (N, B)
    sums = onehot.T @ features                                                   # (B, C)
    cnts = jnp.maximum(onehot.sum(axis=0), 1.0)[:, None]
    ref = sums / cnts

    # approx reciprocal + MXU accumulation order -> slightly looser tolerance.
    assert out.shape == (B, C)
    assert jnp.allclose(out, ref, atol=2e-3, rtol=2e-3), "mismatch vs reference"

    # bf16 streaming path (f32 accumulation) — looser tolerance.
    out_bf = spoc_forward(features.astype(jnp.bfloat16), batch_idx, B)
    out_bf = jax.block_until_ready(out_bf)
    assert out_bf.shape == (B, C)
    assert jnp.allclose(out_bf, ref, atol=2e-2, rtol=2e-2), "bf16 mismatch vs reference"

    print("KERNEL_OK")
</pallas_src>

<mosaic_0001>
module attributes {stable_mosaic.version = 11 : i64} {
  func.func @_spoc_kernel(%arg0: i32, %arg1: i32, %arg2: memref<1x128xi32, #tpu.memory_space<vmem>>, %arg3: memref<128x128xf32, #tpu.memory_space<vmem>>, %arg4: memref<8x128xf32, #tpu.memory_space<vmem>>, %arg5: memref<8x1xf32, #tpu.memory_space<vmem>>) attributes {dimension_semantics = [#tpu.dimension_semantics<parallel>, #tpu.dimension_semantics<arbitrary>], iteration_bounds = array<i64: 1, 1>, scalar_prefetch = 0 : i64, scratch_operands = 1 : i64, tpu.core_type = #tpu.core_type<tc>, window_params = [{transform_indices = @transform_0, window_bounds = array<i64: 1, 128>}, {transform_indices = @transform_1, window_bounds = array<i64: 128, 128>}, {transform_indices = @transform_2, window_bounds = array<i64: 8, 128>}]} {
    %c0_i32 = arith.constant 0 : i32
    %0 = arith.cmpi eq, %arg1, %c0_i32 : i32
    %1 = arith.extui %0 : i1 to i32
    %c0_i32_0 = arith.constant 0 : i32
    %2 = arith.cmpi ne, %1, %c0_i32_0 : i32
    scf.if %2 {
      %cst_15 = arith.constant 0.000000e+00 : f32
      %22 = vector.broadcast %cst_15 : f32 to vector<8x128xf32>
      %c0_16 = arith.constant 0 : index
      %c0_17 = arith.constant 0 : index
      %23 = vector.load %arg4[%c0_16, %c0_17] : memref<8x128xf32, #tpu.memory_space<vmem>>, vector<8x128xf32>
      tpu.vector_store %arg4[%c0_16, %c0_17], %22 {strides = array<i32>} : memref<8x128xf32, #tpu.memory_space<vmem>>, vector<8x128xf32>,
      %cst_18 = arith.constant 0.000000e+00 : f32
      %24 = vector.broadcast %cst_18 : f32 to vector<8x1xf32>
      %c0_19 = arith.constant 0 : index
      %c0_20 = arith.constant 0 : index
      %25 = vector.load %arg5[%c0_19, %c0_20] : memref<8x1xf32, #tpu.memory_space<vmem>>, vector<8x1xf32>
      tpu.vector_store %arg5[%c0_19, %c0_20], %24 {strides = array<i32>} : memref<8x1xf32, #tpu.memory_space<vmem>>, vector<8x1xf32>,
    } else {
    }
    %3 = tpu.iota {dimensions = array<i32: 0>} : vector<8x128xi32>
    %c0 = arith.constant 0 : index
    %c0_1 = arith.constant 0 : index
    %4 = vector.load %arg2[%c0, %c0_1] : memref<1x128xi32, #tpu.memory_space<vmem>>, vector<1x128xi32>
    %5 = vector.broadcast %4 : vector<1x128xi32> to vector<8x128xi32>
    %6 = arith.cmpi eq, %5, %3 : vector<8x128xi32>
    %7 = arith.extui %6 : vector<8x128xi1> to vector<8x128xi32>
    %8 = arith.sitofp %7 : vector<8x128xi32> to vector<8x128xf32>
    %c0_2 = arith.constant 0 : index
    %c0_3 = arith.constant 0 : index
    %9 = vector.load %arg4[%c0_2, %c0_3] : memref<8x128xf32, #tpu.memory_space<vmem>>, vector<8x128xf32>
    %c0_4 = arith.constant 0 : index
    %c0_5 = arith.constant 0 : index
    %10 = vector.load %arg3[%c0_4, %c0_5] : memref<128x128xf32, #tpu.memory_space<vmem>>, vector<128x128xf32>
    %cst = arith.constant dense<0.000000e+00> : vector<8x128xf32>
    %11 = tpu.matmul %8, %10, %cst {dimension_numbers = #tpu.dot_dimension_numbers<[1], [0], [0], [1], [0, 0, 1, 1], [], []>} : vector<8x128xf32>, vector<128x128xf32>, vector<8x128xf32> -> vector<8x128xf32>
    %12 = arith.addf %9, %11 : vector<8x128xf32>
    %c0_6 = arith.constant 0 : index
    %c0_7 = arith.constant 0 : index
    %13 = vector.load %arg4[%c0_6, %c0_7] : memref<8x128xf32, #tpu.memory_space<vmem>>, vector<8x128xf32>
    tpu.vector_store %arg4[%c0_6, %c0_7], %12 {strides = array<i32>} : memref<8x128xf32, #tpu.memory_space<vmem>>, vector<8x128xf32>,
    %c0_8 = arith.constant 0 : index
    %c0_9 = arith.constant 0 : index
    %14 = vector.load %arg5[%c0_8, %c0_9] : memref<8x1xf32, #tpu.memory_space<vmem>>, vector<8x1xf32>
    %cst_10 = arith.constant dense<0.000000e+00> : vector<8xf32>
    %15 = vector.multi_reduction <add>, %8, %cst_10 [1] : vector<8x128xf32> to vector<8xf32>
    %16 = vector.shape_cast %15 : vector<8xf32> to vector<8x1xf32>
    %17 = arith.addf %14, %16 : vector<8x1xf32>
    %c0_11 = arith.constant 0 : index
    %c0_12 = arith.constant 0 : index
    %18 = vector.load %arg5[%c0_11, %c0_12] : memref<8x1xf32, #tpu.memory_space<vmem>>, vector<8x1xf32>
    tpu.vector_store %arg5[%c0_11, %c0_12], %17 {strides = array<i32>} : memref<8x1xf32, #tpu.memory_space<vmem>>, vector<8x1xf32>,
    %c0_i32_13 = arith.constant 0 : i32
    %19 = arith.cmpi eq, %arg1, %c0_i32_13 : i32
    %20 = arith.extui %19 : i1 to i32
    %c0_i32_14 = arith.constant 0 : i32
    %21 = arith.cmpi ne, %20, %c0_i32_14 : i32
    scf.if %21 {
      %c0_15 = arith.constant 0 : index
      %c0_16 = arith.constant 0 : index
      %22 = vector.load %arg5[%c0_15, %c0_16] : memref<8x1xf32, #tpu.memory_space<vmem>>, vector<8x1xf32>
      %cst_17 = arith.constant 1.000000e+00 : f32
      %23 = vector.broadcast %cst_17 : f32 to vector<8x1xf32>
      %24 = arith.maximumf %22, %23 : vector<8x1xf32>
      %25 = tpu.reciprocal %24 {approx = true} : vector<8x1xf32> -> vector<8x1xf32>
      %c0_18 = arith.constant 0 : index
      %c0_19 = arith.constant 0 : index
      %26 = vector.load %arg4[%c0_18, %c0_19] : memref<8x128xf32, #tpu.memory_space<vmem>>, vector<8x128xf32>
      %27 = vector.broadcast %25 : vector<8x1xf32> to vector<8x128xf32>
      %28 = arith.mulf %26, %27 : vector<8x128xf32>
      %c0_20 = arith.constant 0 : index
      %c0_21 = arith.constant 0 : index
      %29 = vector.load %arg4[%c0_20, %c0_21] : memref<8x128xf32, #tpu.memory_space<vmem>>, vector<8x128xf32>
      tpu.vector_store %arg4[%c0_20, %c0_21], %28 {strides = array<i32>} : memref<8x128xf32, #tpu.memory_space<vmem>>, vector<8x128xf32>,
    } else {
    }
    return
  }
  func.func @transform_0(%arg0: i32, %arg1: i32) -> (i32, i32) {
    %c0_i32 = arith.constant 0 : i32
    %c0_i32_0 = arith.constant 0 : i32
    return %c0_i32, %arg1 : i32, i32
  }
  func.func @transform_1(%arg0: i32, %arg1: i32) -> (i32, i32) {
    %c0_i32 = arith.constant 0 : i32
    return %arg1, %arg0 : i32, i32
  }
  func.func @transform_2(%arg0: i32, %arg1: i32) -> (i32, i32) {
    %c0_i32 = arith.constant 0 : i32
    %c0_i32_0 = arith.constant 0 : i32
    return %c0_i32, %arg0 : i32, i32
  }
}

</mosaic_0001>

<bundles_post_ra>
// kernel: tpu_custom_call.1
= control target key start
LH: loop header
LB: loop body
LE: loop exit
PB: predicated region body
PF: predicated region fallthrough
CT: control target
= control target key end

     0   :  { %7 = vsyncpa [#allocation4], 0  ;;  %s261_s0 = inlined_call_operand.hbm [shape: s32[1,128], index: 0, kind: input, shape index: {}]   ;;  %s262_s1 = inlined_call_operand.hbm [shape: f32[128,128], index: 1, kind: input, shape index: {}]   ;;  %s263_s2 = inlined_call_operand.hbm [shape: f32[8,128], index: 2, kind: output, shape index: {}]  }
   0x1   :  { %8 = vsyncpa [#allocation7], 0 }
   0x2   :  { %9 = vsyncpa [#allocation5], 0  ;;  %s15_s11 = sshll.u32 %s261_s0, 4  ;;  %s225_s12 = smov [#allocation3]   ;;  %s16_s11 = int_to_ptr.hbm [resolvable:$true] %s15_s11 }
   0x3   :  { %s17_s13 = sshll.u32 %s225_s12, 4  ;;  %s25_s16 = sshll.u32 %s262_s1, 4  ;;  %s18_s13 = int_to_ptr.vmem [resolvable:$true] %s17_s13  ;;  %s26_s16 = int_to_ptr.hbm [resolvable:$true] %s25_s16 }
   0x4   :  { %20 = dma.hbm_to_vmem [thread:$0]  %s16_s11, 16, %s18_s13, [#allocation4]  }
   0x5   :  { %s226_s17 = smov [#allocation6]   ;;  %s227_s19 = smov 128  }
   0x6   :  { %s27_s18 = sshll.u32 %s226_s17, 4  ;;  %s228_s20 = smov 8   ;;  %s28_s18 = int_to_ptr.vmem [resolvable:$true] %s27_s18 }
   0x7   :  { %33 = dma.hbm_to_vmem [thread:$0]  %s26_s16, 2048, %s28_s18, [#allocation7], %s227_s19, %s227_s19, %s228_s20  }
   0x8   :  { %219 = dma.done.wait [#allocation4], 16  }
   0x9   :  { %220 = vsyncadd [#allocation4], 4294967280 }
   0xa   :  { %221 = dma.done.wait [#allocation7], 2048  }
   0xb   :  { %222 = vsyncadd [#allocation7], 4294965248  ;;  %vm47_vm0 = vcmask 7168   ;;  %v49_v0 = vlaneseq  ;;  %v229_v1 = vmov 0.0   ;;  %v144_v3 = vld [vmem:[#allocation3] ss:$0 sm:$0xff] }
   0xc   :  { %48 = vst.msk [vmem:[#allocation2] sm:$0xff] %vm47_vm0, %v229_v1  ;;  %v72_v4 = vld [vmem:[#allocation6 + $0x78] sm:$0xff]  ;;  %v71_v5 = vld [vmem:[#allocation6 + $0x70] sm:$0xff]  ;;  %v70_v6 = vld [vmem:[#allocation6 + $0x68] sm:$0xff]  ;;  %v230_v21 = vmov 1.0   ;;  %v231_v22 = vmov 0  }
   0xd   :  { %v50_v2 = vshrl.u32 %v49_v0, 7  ;;  %73 = vmatpush.msra.mxu0 %v72_v4  ;;  %v69_v8 = vld [vmem:[#allocation6 + $0x60] sm:$0xff]  ;;  %v68_v9 = vld [vmem:[#allocation6 + $0x58] sm:$0xff]  ;;  %v67_v10 = vld [vmem:[#allocation6 + $0x50] sm:$0xff]  ;;  %143 = vset.pattern.permute.xlu0 %v231_v22  ;;  %s232_s0 = smov [#allocation8]   ;;  %s122_s23 = sshll.u32 %s263_s2, 4  ;;  %s123_s23 = int_to_ptr.hbm [resolvable:$true] %s122_s23 }
   0xe   :  { %v66_v11 = vld [vmem:[#allocation6 + $0x48] sm:$0xff]  ;;  %v65_v12 = vld [vmem:[#allocation6 + $0x40] sm:$0xff]  ;;  %v64_v13 = vld [vmem:[#allocation6 + $0x38] sm:$0xff]  ;;  %s120_s1 = sshll.u32 %s232_s0, 4  ;;  %s121_s1 = int_to_ptr.vmem [resolvable:$true] %s120_s1 }
   0xf   :  { %vm53_vm1 = vcmp.eq.s32.totalorder %v144_v3, %v50_v2  ;;  %74 = vmatpush.msra.mxu0 %v71_v5  ;;  %v63_v14 = vld [vmem:[#allocation6 + $0x30] sm:$0xff]  ;;  %v62_v15 = vld [vmem:[#allocation6 + $0x28] sm:$0xff]  ;;  %v61_v16 = vld [vmem:[#allocation6 + $0x20] sm:$0xff] }
  0x10   :  { %v133_v7 = vsel %vm53_vm1, 1.0, %v229_v1  ;;  %v60_v17 = vld [vmem:[#allocation6 + $0x18] sm:$0xff]  ;;  %v59_v18 = vld [vmem:[#allocation6 + $0x10] sm:$0xff]  ;;  %v58_v19 = vld [vmem:[#allocation6 + $0x8] sm:$0xff] }
  0x11   :  { %96 = vadd.xlane.f32.xlu0 %v133_v7  ;;  %75 = vmatpush.msra.mxu0 %v70_v6  ;;  %v57_v20 = vld [vmem:[#allocation6] sm:$0xff] }
  0x13   :  { %76 = vmatpush.msra.mxu0 %v69_v8  ;;  %v95_v23 = vld [vmem:[#allocation2] sm:$0xff] }
  0x15   :  { %77 = vmatpush.msra.mxu0 %v68_v9 }
  0x17   :  { %78 = vmatpush.msra.mxu0 %v67_v10 }
  0x19   :  { %79 = vmatpush.msra.mxu0 %v66_v11 }
  0x1b   :  { %80 = vmatpush.msra.mxu0 %v65_v12 }
  0x1d   :  { %81 = vmatpush.msra.mxu0 %v64_v13 }
  0x1f   :  { %82 = vmatpush.msra.mxu0 %v63_v14 }
  0x21   :  { %83 = vmatpush.msra.mxu0 %v62_v15 }
  0x23   :  { %84 = vmatpush.msra.mxu0 %v61_v16 }
  0x25   :  { %85 = vmatpush.msra.mxu0 %v60_v17 }
  0x27   :  { %86 = vmatpush.msra.mxu0 %v59_v18 }
  0x29   :  { %87 = vmatpush.msra.mxu0 %v58_v19 }
  0x2b   :  { %88 = vmatpush.msra.mxu0 %v57_v20 }
  0x2c   :  { %134 = vmatmul.msk.f32.vlgmr.msra.gmra.mxu0 %vm53_vm1, %v230_v21 }
  0x84   :  { %v97_v24 = vpop.xlane.xlu0 %96 }
  0x85   :  { %v98_v25 = vadd.f32 %v97_v24, %v95_v23 }
  0x87   :  { %100 = vst.msk [vmem:[#allocation2] sm:$0xff] %vm47_vm0, %v98_v25 }
  0x8e   :  { %v104_v26 = vld [vmem:[#allocation2] sm:$0xff] }
  0x8f   :  { %v105_v27 = vmax.f32 %v104_v26, 1.0 }
  0x91   :  { %145 = vrcp.f32 %v105_v27 }
  0x97   :  { %v146_v28 = vpop.eup %145 }
  0x98   :  { %110 = vperm.xlu0 %143, %v146_v28  }
  0xa9   :  { %v90_v29 = vpop.f32.mrf.mxu0 }
 0x10a   :  { %v111_v30 = vpop.permute.xlu0 %110 }
 0x10b   :  { %v113_v31 = vmul.f32 %v111_v30, %v90_v29 }
 0x10d   :  { %114 = vst [vmem:[#allocation8] sm:$0xff] %v113_v31 }
 0x10e   :  { %125 = dma.vmem_to_hbm [thread:$0]  %s121_s1, 128, %s123_s23, [#allocation5]  }
 0x10f   :  { %223 = dma.done.wait [#allocation5], 128  }
 0x110   :  { %224 = vsyncadd [#allocation5], 4294967168 }
 0x111   :  { %130 = vsyncpa [#allocation4], 1 }
 0x112   :  { %131 = vsyncpa [#allocation7], 1 }
 0x113   :  { %132 = vsyncpa [#allocation5], 1 }

</bundles_post_ra>
